<compile_context>
chip_gen: v7x
topology: tpu7x:2x2x1
jax: 0.10.0
libtpu: 0.0.40
codegen_flags: <defaults>
</compile_context>

<pallas_src>
import functools

import jax
import jax.numpy as jnp
from jax.experimental import pallas as pl
from jax.experimental.pallas import tpu as pltpu


def _round_up(x, m):
    return ((x + m - 1) // m) * m


def _vmem_block_bytes(shape, dtype):
    """Rough VMEM footprint of a block: last dim padded to 128 lanes, 2nd-last to 8 sublanes."""
    dims = [int(d) for d in shape]
    if len(dims) >= 1:
        dims[-1] = _round_up(dims[-1], 128)
    if len(dims) >= 2:
        dims[-2] = _round_up(dims[-2], 8)
    n = 1
    for d in dims:
        n *= d
    return n * jnp.dtype(dtype).itemsize


def _vmem_capacity_bytes():
    try:
        return int(pltpu.get_tpu_info().vmem_capacity_bytes)
    except Exception:
        return 64 * 1024 * 1024          # conservative fallback: v7x per-TensorCore VMEM


def _num_tensorcores_per_chip():
    # v5e / v6e: 1 TensorCore per chip; v7x: 2.
    try:
        kind = jax.devices()[0].device_kind.lower()
    except Exception:
        return 1
    return 2 if "v7" in kind else 1


def _choose_tiles(B, P, Cin, NC2, K, in_dtype, out_dtype, num_tc, vmem_cap, kt=None):
    """Pick (bt, kt) against the HBM roofline and the per-generation VMEM budget."""
    flatten_out = (Cin % 128 != 0)
    budget = int(0.45 * vmem_cap)        # headroom for double-buffering + compiler scratch

    def block_bytes(bt_, kt_):
        out_block = (bt_, kt_ * Cin) if flatten_out else (bt_, kt_, Cin)
        per_step = (_vmem_block_bytes((bt_, P, Cin), in_dtype)
                    + _vmem_block_bytes((Cin, NC2 * Cin), in_dtype)
                    + _vmem_block_bytes((bt_, NC2, kt_, P), in_dtype)
                    + _vmem_block_bytes(out_block, out_dtype))
        scratch = _vmem_block_bytes((bt_, P, NC2 * Cin), in_dtype)
        return 2 * per_step + scratch    # BlockSpec double-buffers each operand

    def kt_ok(kt_):
        if kt_ == K:
            return True
        if K % kt_ != 0 or kt_ % 8 != 0:                  # sublane alignment of partial blocks
            return False
        return (Cin % 128 == 0) or ((kt_ * Cin) % 128 == 0)   # lane-dense flat output blocks

    if kt is None:
        kt = K
        if block_bytes(1, kt) > budget:  # large-K shapes (e.g. v7x 64 MiB VMEM): tile K
            for cand in range(K - 8, 7, -8):
                if kt_ok(cand) and block_bytes(1, cand) <= budget:
                    kt = cand
                    break
    assert kt_ok(kt), f"invalid K tile {kt} for K={K}, Cin={Cin}"

    # Batch tile: target a few-hundred-KiB c_t block per grid step (HBM-roofline regime),
    # only force multiple grid steps on multi-TensorCore chips (v7x), fit the VMEM
    # budget, and prefer a tile that divides B (avoid zero-padding the dominant tensor).
    itemsize = jnp.dtype(in_dtype).itemsize
    ct_row_bytes = max(1, NC2 * kt * P * itemsize)
    bt = max(1, min(B, -(-(512 * 1024) // ct_row_bytes)))
    if num_tc >= 2 and B >= num_tc:
        bt = min(bt, -(-B // num_tc))    # >= num_tc batch steps so both v7x TCs get work
    while bt > 1 and block_bytes(bt, kt) > budget:
        bt -= 1
    for d in range(bt, max(1, bt // 2) - 1, -1):
        if B % d == 0:
            bt = d
            break
    return bt, kt, flatten_out, block_bytes(bt, kt)


def _p2t_kernel(pf_ref, wt_ref, ct_ref, out_ref, tmp_ref, *, nc2, flatten_out):
    """One (batch-tile, K-tile) grid step.

    pf_ref : (bt, P, Cin)       place features (batch tile)
    wt_ref : (Cin, NC2*Cin)     pre-transposed linear weight (shared, tiny)
    ct_ref : (bt, NC2, kt, P)   C_t_stack in its native layout (no wrapper relayout)
    out_ref: (bt, kt*Cin) if flatten_out else (bt, kt, Cin)
    tmp_ref: VMEM scratch (bt, P, NC2*Cin) -- fc_p2t result, computed once per batch
             tile at the first K step and reused across all K tiles.
    """
    bt, p, cin = pf_ref.shape
    kt = ct_ref.shape[2]

    # 1) fc_p2t once per batch tile: (bt*P, Cin) @ (Cin, NC2*Cin); row-major reshapes only.
    @pl.when(pl.program_id(1) == 0)
    def _():
        pf = pf_ref[...].reshape(bt * p, cin)
        t = jnp.dot(pf, wt_ref[...], preferred_element_type=jnp.float32)
        tmp_ref[...] = t.reshape(bt, p, nc2 * cin).astype(tmp_ref.dtype)

    # 2) out[b,k,c] = sum_n sum_p ct[b,n,k,p] * tmp[b,p,n*Cin+c].
    #    NC2 = 2*num_classes is tiny -> static unroll; each term is a (kt,P)@(P,Cin)
    #    MXU dot batched over bt.  The kernel is HBM-bound, so MXU shape is not the
    #    binding slot; this formulation avoids any relayout of the dominant tensor.
    def term(n):
        return jnp.einsum("bkp,bpc->bkc",
                          ct_ref[:, n, :, :],                     # (bt, kt, P)
                          tmp_ref[:, :, n * cin:(n + 1) * cin],   # (bt, P, Cin)
                          preferred_element_type=jnp.float32)

    acc = term(0)
    for n in range(1, nc2):
        acc = acc + term(n)

    # 3) Lane-dense store: when Cin < 128 flatten (kt, Cin) onto the lane axis so the
    #    output block is 2-D, all 8 sublanes valid, full unmasked vst.
    if flatten_out:
        out_ref[...] = acc.reshape(bt, kt * cin).astype(out_ref.dtype)
    else:
        out_ref[...] = acc.astype(out_ref.dtype)


def final_p2t_forward(c_t_stack, place_features, weight, num_classes,
                      *, compute_dtype=None, kt=None):
    """Pallas implementation of FinalP2TLayer.forward.

    compute_dtype: optional (e.g. jnp.bfloat16) -- halves HBM bytes on the dominant
                   c_t_stack read and doubles MXU throughput; accumulation stays f32.
    kt           : optional K-tile override (must divide K; mainly for testing).
    """
    B, P, Cin = place_features.shape
    Bc, NC2, K, Pc = c_t_stack.shape
    assert Bc == B and Pc == P and NC2 == num_classes * 2
    assert weight.shape == (NC2 * Cin, Cin)
    out_dtype = place_features.dtype
    if compute_dtype is None:
        compute_dtype = place_features.dtype

    # Wrapper-side prep touches only the small tensors; c_t_stack keeps its native
    # (B, NC2, K, P) layout (astype is a no-op unless bf16 compute is requested).
    w_t = weight.T.astype(compute_dtype)               # (Cin, NC2*Cin)
    pf = place_features.astype(compute_dtype)
    ct = c_t_stack.astype(compute_dtype)

    num_tc = _num_tensorcores_per_chip()
    vmem_cap = _vmem_capacity_bytes()
    bt, kt, flatten_out, need = _choose_tiles(
        B, P, Cin, NC2, K, compute_dtype, out_dtype, num_tc, vmem_cap, kt=kt)

    nb = pl.cdiv(B, bt)
    nk = K // kt
    b_pad = nb * bt
    if b_pad != B:    # fallback only; tile choice prefers divisors of B to avoid this copy
        pf = jnp.pad(pf, ((0, b_pad - B), (0, 0), (0, 0)))
        ct = jnp.pad(ct, ((0, b_pad - B), (0, 0), (0, 0), (0, 0)))

    if flatten_out:
        out_shape = jax.ShapeDtypeStruct((b_pad, K * Cin), out_dtype)
        out_spec = pl.BlockSpec((bt, kt * Cin), lambda b, k: (b, k))
    else:
        out_shape = jax.ShapeDtypeStruct((b_pad, K, Cin), out_dtype)
        out_spec = pl.BlockSpec((bt, kt, Cin), lambda b, k: (b, k, 0))

    vmem_limit = int(min(0.9 * vmem_cap, max(2 * need, 32 * 1024 * 1024)))

    kernel = functools.partial(_p2t_kernel, nc2=NC2, flatten_out=flatten_out)
    out = pl.pallas_call(
        kernel,
        out_shape=out_shape,
        grid_spec=pltpu.PrefetchScalarGridSpec(
            num_scalar_prefetch=0,
            grid=(nb, nk),
            in_specs=[
                pl.BlockSpec((bt, P, Cin), lambda b, k: (b, 0, 0)),
                pl.BlockSpec((Cin, NC2 * Cin), lambda b, k: (0, 0)),
                pl.BlockSpec((bt, NC2, kt, P), lambda b, k: (b, 0, k, 0)),
            ],
            out_specs=out_spec,
            scratch_shapes=[pltpu.VMEM((bt, P, NC2 * Cin), compute_dtype)],
        ),
        # Batch axis is independent ("parallel"); K axis reuses the tmp scratch, so it
        # must stay "arbitrary".
        # TODO(synk): on v7x verify "parallel" actually shards the batch axis across
        # both TensorCores; if not, switch that axis to pltpu.CORE_PARALLEL (nb is
        # already kept >= num_tc above).
        compiler_params=pltpu.CompilerParams(
            dimension_semantics=("parallel", "arbitrary"),
            vmem_limit_bytes=vmem_limit),
    )(pf, w_t, ct)

    out = out.reshape(b_pad, K, Cin)
    return out[:B]


def final_p2t_reference(c_t_stack, place_features, weight, num_classes):
    """Plain-JAX reference mirroring the PyTorch code."""
    B, P, Cin = place_features.shape
    nc2 = num_classes * 2
    tmp = jnp.einsum("bpi,oi->bpo", place_features, weight)          # (B, P, NC2*Cin)
    tmp = tmp.reshape(B, P, nc2, Cin).transpose(0, 2, 1, 3)          # (B, NC2, P, Cin)
    return jnp.einsum("bnkp,bnpc->bkc", c_t_stack, tmp)              # sum over NC2


def _run_case(key, B, P, Cin, num_classes, K, *, compute_dtype=None, kt=None,
              atol=1e-4, rtol=1e-4):
    NC2 = num_classes * 2
    k_w, k_pf, k_ct = jax.random.split(key, 3)
    weight = (jax.random.uniform(k_w, (NC2 * Cin, Cin), dtype=jnp.float32,
                                 minval=-1.0, maxval=1.0) / jnp.sqrt(float(Cin)))
    place_features = jax.random.normal(k_pf, (B, P, Cin), dtype=jnp.float32)
    c_t_stack = jax.random.normal(k_ct, (B, NC2, K, P), dtype=jnp.float32)

    out = final_p2t_forward(c_t_stack, place_features, weight, num_classes,
                            compute_dtype=compute_dtype, kt=kt)
    out = jax.block_until_ready(out)
    ref = final_p2t_reference(c_t_stack, place_features, weight, num_classes)
    assert out.shape == (B, K, Cin)
    max_err = float(jnp.max(jnp.abs(out - ref)))
    assert jnp.allclose(out, ref, atol=atol, rtol=rtol), \
        f"mismatch vs reference (max abs err {max_err:.3e})"


if __name__ == "__main__":
    key = jax.random.PRNGKey(0)
    k1, k2, k3, k4 = jax.random.split(key, 4)

    # Small deterministic shapes (B, P, Cin, num_classes, K).
    _run_case(k1, B=2, P=8, Cin=32, num_classes=2, K=8)
    # Uneven batch + NC2 = 6.
    _run_case(k2, B=5, P=8, Cin=32, num_classes=3, K=16)
    # Exercise the K grid axis (kt < K): fc_p2t scratch reused across K tiles.
    _run_case(k3, B=3, P=8, Cin=32, num_classes=2, K=64, kt=16)
    # Optional bf16 compute path (f32 accumulation); looser tolerance.
    _run_case(k4, B=4, P=8, Cin=32, num_classes=2, K=32,
              compute_dtype=jnp.bfloat16, atol=1e-1, rtol=1e-1)

    print("KERNEL_OK")
</pallas_src>

<mosaic_0001>
module attributes {stable_mosaic.version = 11 : i64} {
  func.func @_p2t_kernel(%arg0: i32, %arg1: i32, %arg2: memref<2x8x32xf32, #tpu.memory_space<vmem>>, %arg3: memref<32x128xf32, #tpu.memory_space<vmem>>, %arg4: memref<2x4x8x8xf32, #tpu.memory_space<vmem>>, %arg5: memref<2x256xf32, #tpu.memory_space<vmem>>, %arg6: memref<2x8x128xf32, #tpu.memory_space<vmem>>) attributes {dimension_semantics = [#tpu.dimension_semantics<parallel>, #tpu.dimension_semantics<arbitrary>], iteration_bounds = array<i64: 1, 1>, scalar_prefetch = 0 : i64, scratch_operands = 1 : i64, tpu.core_type = #tpu.core_type<tc>, window_params = [{transform_indices = @transform_0, window_bounds = array<i64: 2, 8, 32>}, {pipeline_mode = #tpu.pipeline_mode<synchronous>, transform_indices = @transform_1, window_bounds = array<i64: 32, 128>}, {transform_indices = @transform_2, window_bounds = array<i64: 2, 4, 8, 8>}, {transform_indices = @transform_3, window_bounds = array<i64: 2, 256>}]} {
    %c0_i32 = arith.constant 0 : i32
    %0 = arith.cmpi eq, %arg1, %c0_i32 : i32
    %1 = arith.extui %0 : i1 to i32
    %c0_i32_0 = arith.constant 0 : i32
    %2 = arith.cmpi ne, %1, %c0_i32_0 : i32
    scf.if %2 {
      %c0_27 = arith.constant 0 : index
      %c0_28 = arith.constant 0 : index
      %c0_29 = arith.constant 0 : index
      %24 = vector.load %arg2[%c0_27, %c0_28, %c0_29] : memref<2x8x32xf32, #tpu.memory_space<vmem>>, vector<2x8x32xf32>
      %25 = vector.shape_cast %24 : vector<2x8x32xf32> to vector<16x32xf32>
      %c0_30 = arith.constant 0 : index
      %c0_31 = arith.constant 0 : index
      %26 = vector.load %arg3[%c0_30, %c0_31] : memref<32x128xf32, #tpu.memory_space<vmem>>, vector<32x128xf32>
      %cst_32 = arith.constant dense<0.000000e+00> : vector<16x128xf32>
      %27 = tpu.matmul %25, %26, %cst_32 {dimension_numbers = #tpu.dot_dimension_numbers<[1], [0], [0], [1], [0, 0, 1, 1], [], []>} : vector<16x32xf32>, vector<32x128xf32>, vector<16x128xf32> -> vector<16x128xf32>
      %28 = vector.shape_cast %27 : vector<16x128xf32> to vector<2x8x128xf32>
      %c0_33 = arith.constant 0 : index
      %c0_34 = arith.constant 0 : index
      %c0_35 = arith.constant 0 : index
      %29 = vector.load %arg6[%c0_33, %c0_34, %c0_35] : memref<2x8x128xf32, #tpu.memory_space<vmem>>, vector<2x8x128xf32>
      tpu.vector_store %arg6[%c0_33, %c0_34, %c0_35], %28 {strides = array<i32>} : memref<2x8x128xf32, #tpu.memory_space<vmem>>, vector<2x8x128xf32>,
    } else {
    }
    %c0 = arith.constant 0 : index
    %c0_1 = arith.constant 0 : index
    %c0_2 = arith.constant 0 : index
    %c0_3 = arith.constant 0 : index
    %3 = vector.load %arg4[%c0, %c0_1, %c0_2, %c0_3] : memref<2x4x8x8xf32, #tpu.memory_space<vmem>>, vector<2x1x8x8xf32>
    %4 = vector.shape_cast %3 : vector<2x1x8x8xf32> to vector<2x8x8xf32>
    %c0_4 = arith.constant 0 : index
    %c0_5 = arith.constant 0 : index
    %c0_6 = arith.constant 0 : index
    %5 = vector.load %arg6[%c0_4, %c0_5, %c0_6] : memref<2x8x128xf32, #tpu.memory_space<vmem>>, vector<2x8x32xf32>
    "tpu.trace_start"() <{level = 10 : i32, message = "bkp,bpc->bkc"}> : () -> ()
    %cst = arith.constant dense<0.000000e+00> : vector<2x8x32xf32>
    %6 = tpu.matmul %4, %5, %cst {dimension_numbers = #tpu.dot_dimension_numbers<[2], [1], [1], [2], [0, 0, 0, 1, 1, 2], [0], [0]>} : vector<2x8x8xf32>, vector<2x8x32xf32>, vector<2x8x32xf32> -> vector<2x8x32xf32>
    "tpu.trace_stop"() : () -> ()
    %c0_7 = arith.constant 0 : index
    %c1 = arith.constant 1 : index
    %c0_8 = arith.constant 0 : index
    %c0_9 = arith.constant 0 : index
    %7 = vector.load %arg4[%c0_7, %c1, %c0_8, %c0_9] : memref<2x4x8x8xf32, #tpu.memory_space<vmem>>, vector<2x1x8x8xf32>
    %8 = vector.shape_cast %7 : vector<2x1x8x8xf32> to vector<2x8x8xf32>
    %c0_10 = arith.constant 0 : index
    %c0_11 = arith.constant 0 : index
    %c32 = arith.constant 32 : index
    %9 = vector.load %arg6[%c0_10, %c0_11, %c32] : memref<2x8x128xf32, #tpu.memory_space<vmem>>, vector<2x8x32xf32>
    "tpu.trace_start"() <{level = 10 : i32, message = "bkp,bpc->bkc"}> : () -> ()
    %cst_12 = arith.constant dense<0.000000e+00> : vector<2x8x32xf32>
    %10 = tpu.matmul %8, %9, %cst_12 {dimension_numbers = #tpu.dot_dimension_numbers<[2], [1], [1], [2], [0, 0, 0, 1, 1, 2], [0], [0]>} : vector<2x8x8xf32>, vector<2x8x32xf32>, vector<2x8x32xf32> -> vector<2x8x32xf32>
    "tpu.trace_stop"() : () -> ()
    %11 = arith.addf %6, %10 : vector<2x8x32xf32>
    %c0_13 = arith.constant 0 : index
    %c2 = arith.constant 2 : index
    %c0_14 = arith.constant 0 : index
    %c0_15 = arith.constant 0 : index
    %12 = vector.load %arg4[%c0_13, %c2, %c0_14, %c0_15] : memref<2x4x8x8xf32, #tpu.memory_space<vmem>>, vector<2x1x8x8xf32>
    %13 = vector.shape_cast %12 : vector<2x1x8x8xf32> to vector<2x8x8xf32>
    %c0_16 = arith.constant 0 : index
    %c0_17 = arith.constant 0 : index
    %c64 = arith.constant 64 : index
    %14 = vector.load %arg6[%c0_16, %c0_17, %c64] : memref<2x8x128xf32, #tpu.memory_space<vmem>>, vector<2x8x32xf32>
    "tpu.trace_start"() <{level = 10 : i32, message = "bkp,bpc->bkc"}> : () -> ()
    %cst_18 = arith.constant dense<0.000000e+00> : vector<2x8x32xf32>
    %15 = tpu.matmul %13, %14, %cst_18 {dimension_numbers = #tpu.dot_dimension_numbers<[2], [1], [1], [2], [0, 0, 0, 1, 1, 2], [0], [0]>} : vector<2x8x8xf32>, vector<2x8x32xf32>, vector<2x8x32xf32> -> vector<2x8x32xf32>
    "tpu.trace_stop"() : () -> ()
    %16 = arith.addf %11, %15 : vector<2x8x32xf32>
    %c0_19 = arith.constant 0 : index
    %c3 = arith.constant 3 : index
    %c0_20 = arith.constant 0 : index
    %c0_21 = arith.constant 0 : index
    %17 = vector.load %arg4[%c0_19, %c3, %c0_20, %c0_21] : memref<2x4x8x8xf32, #tpu.memory_space<vmem>>, vector<2x1x8x8xf32>
    %18 = vector.shape_cast %17 : vector<2x1x8x8xf32> to vector<2x8x8xf32>
    %c0_22 = arith.constant 0 : index
    %c0_23 = arith.constant 0 : index
    %c96 = arith.constant 96 : index
    %19 = vector.load %arg6[%c0_22, %c0_23, %c96] : memref<2x8x128xf32, #tpu.memory_space<vmem>>, vector<2x8x32xf32>
    "tpu.trace_start"() <{level = 10 : i32, message = "bkp,bpc->bkc"}> : () -> ()
    %cst_24 = arith.constant dense<0.000000e+00> : vector<2x8x32xf32>
    %20 = tpu.matmul %18, %19, %cst_24 {dimension_numbers = #tpu.dot_dimension_numbers<[2], [1], [1], [2], [0, 0, 0, 1, 1, 2], [0], [0]>} : vector<2x8x8xf32>, vector<2x8x32xf32>, vector<2x8x32xf32> -> vector<2x8x32xf32>
    "tpu.trace_stop"() : () -> ()
    %21 = arith.addf %16, %20 : vector<2x8x32xf32>
    %22 = vector.shape_cast %21 : vector<2x8x32xf32> to vector<2x256xf32>
    %c0_25 = arith.constant 0 : index
    %c0_26 = arith.constant 0 : index
    %23 = vector.load %arg5[%c0_25, %c0_26] : memref<2x256xf32, #tpu.memory_space<vmem>>, vector<2x256xf32>
    tpu.vector_store %arg5[%c0_25, %c0_26], %22 {strides = array<i32>} : memref<2x256xf32, #tpu.memory_space<vmem>>, vector<2x256xf32>,
    return
  }
  func.func @transform_0(%arg0: i32, %arg1: i32) -> (i32, i32, i32) {
    %c0_i32 = arith.constant 0 : i32
    %c0_i32_0 = arith.constant 0 : i32
    %c0_i32_1 = arith.constant 0 : i32
    return %arg0, %c0_i32, %c0_i32_0 : i32, i32, i32
  }
  func.func @transform_1(%arg0: i32, %arg1: i32) -> (i32, i32) {
    %c0_i32 = arith.constant 0 : i32
    %c0_i32_0 = arith.constant 0 : i32
    %c0_i32_1 = arith.constant 0 : i32
    return %c0_i32, %c0_i32_0 : i32, i32
  }
  func.func @transform_2(%arg0: i32, %arg1: i32) -> (i32, i32, i32, i32) {
    %c0_i32 = arith.constant 0 : i32
    %c0_i32_0 = arith.constant 0 : i32
    %c0_i32_1 = arith.constant 0 : i32
    return %arg0, %c0_i32, %arg1, %c0_i32_0 : i32, i32, i32, i32
  }
  func.func @transform_3(%arg0: i32, %arg1: i32) -> (i32, i32) {
    %c0_i32 = arith.constant 0 : i32
    return %arg0, %arg1 : i32, i32
  }
}

</mosaic_0001>

<bundles_post_ra>
// kernel: tpu_custom_call.1
= control target key start
LH: loop header
LB: loop body
LE: loop exit
PB: predicated region body
PF: predicated region fallthrough
CT: control target
= control target key end

     0   :  { %8 = vsyncpa [#allocation4], 0  ;;  %s1269_s0 = inlined_call_operand.hbm [shape: f32[2,8,32], index: 0, kind: input, shape index: {}]   ;;  %s1270_s1 = inlined_call_operand.hbm [shape: f32[32,128], index: 1, kind: input, shape index: {}]   ;;  %s1271_s2 = inlined_call_operand.hbm [shape: f32[2,4,8,8], index: 2, kind: input, shape index: {}]   ;;  %s1272_s3 = inlined_call_operand.hbm [shape: f32[2,256], index: 3, kind: output, shape index: {}]  }
   0x1   :  { %9 = vsyncpa [#allocation7], 0 }
   0x2   :  { %10 = vsyncpa [#allocation5], 0  ;;  %s1118_s12 = smov [#allocation6]   ;;  %s1119_s14 = smov [#allocation3]  }
   0x3   :  { %s28_s13 = sshll.u32 %s1118_s12, 4  ;;  %s16_s15 = sshll.u32 %s1119_s14, 4  ;;  %s29_s13 = int_to_ptr.vmem [resolvable:$true] %s28_s13  ;;  %s1151_s15 = int_to_ptr.vmem [resolvable:$true] %s16_s15 }
   0x4   :  { %s1024_s18 = scalar_lea.hbm %s1270_s1, 512 }
   0x5   :  { %p1025_p0 = scmp.ne.s32.totalorder %s1270_s1, %s1024_s18  ;;  %p1028_p1 = scmp.lt.u32.totalorder %s1024_s18, %s1270_s1 }
   0x7   :  { %p1030_p2 = pnand %p1028_p1, %p1025_p0 }
   0x9   :  { %1033 = shalt.err (!%p1030_p2)
}
   0xa   :  { %s1034_s23 = scalar_lea.vmem %s29_s13, 512  ;;  %p1039_p4 = scmp.lt.s32.totalorder %s29_s13, %s29_s13 }
   0xb   :  { %p1035_p3 = scmp.ne.s32.totalorder %s29_s13, %s1034_s23  ;;  %p1040_p5 = scmp.lt.s32.totalorder %s1034_s23, %s1034_s23 }
   0xd   :  { %p1041_p6 = por %p1040_p5, %p1039_p4 }
   0xf   :  { %p1042_p7 = pnand %p1041_p6, %p1035_p3 }
  0x11   :  { %1045 = shalt.err (!%p1042_p7)
}
  0x12   :  { %s1120_s24 = smov 128   ;;  %s1121_s25 = smov 8  }
  0x13   :  { %34 = dma.hbm_to_vmem [thread:$0]  %s1270_s1, 512, %s29_s13, [#allocation7], %s1120_s24, %s1120_s24, %s1121_s25  }
  0x14   :  { %s1046_s30 = scalar_lea.hbm %s1269_s0, 256 }
  0x15   :  { %p1047_p8 = scmp.ne.s32.totalorder %s1269_s0, %s1046_s30  ;;  %p1050_p9 = scmp.lt.u32.totalorder %s1046_s30, %s1269_s0 }
  0x17   :  { %p1052_p10 = pnand %p1050_p9, %p1047_p8 }
  0x19   :  { %1055 = shalt.err (!%p1052_p10)
}
  0x1a   :  { %s1056_s8 = scalar_lea.vmem %s1151_s15, 256  ;;  %p1061_p12 = scmp.lt.s32.totalorder %s1151_s15, %s1151_s15 }
  0x1b   :  { %p1057_p11 = scmp.ne.s32.totalorder %s1151_s15, %s1056_s8  ;;  %p1062_p13 = scmp.lt.s32.totalorder %s1056_s8, %s1056_s8 }
  0x1d   :  { %p1063_p0 = por %p1062_p13, %p1061_p12 }
  0x1f   :  { %p1064_p1 = pnand %p1063_p0, %p1057_p11 }
  0x21   :  { %1067 = shalt.err (!%p1064_p1)
}
  0x22   :  { %22 = dma.hbm_to_vmem [thread:$0]  %s1269_s0, 256, %s1151_s15, [#allocation4], %s1120_s24, %s1120_s24, %s1121_s25  }
  0x23   :  { %s1122_s10 = smov [#allocation8]   ;;  %s1068_s14 = scalar_lea.hbm %s1271_s2, 1024 }
  0x24   :  { %s40_s11 = sshll.u32 %s1122_s10, 4  ;;  %p1069_p2 = scmp.ne.s32.totalorder %s1271_s2, %s1068_s14  ;;  %s41_s11 = int_to_ptr.vmem [resolvable:$true] %s40_s11 }
  0x25   :  { %p1072_p3 = scmp.lt.u32.totalorder %s1068_s14, %s1271_s2 }
  0x27   :  { %p1074_p4 = pnand %p1072_p3, %p1069_p2 }
  0x29   :  { %1077 = shalt.err (!%p1074_p4)
}
  0x2a   :  { %s1078_s20 = scalar_lea.vmem %s41_s11, 1024  ;;  %p1083_p6 = scmp.lt.s32.totalorder %s41_s11, %s41_s11 }
  0x2b   :  { %p1079_p5 = scmp.ne.s32.totalorder %s41_s11, %s1078_s20  ;;  %p1084_p7 = scmp.lt.s32.totalorder %s1078_s20, %s1078_s20 }
  0x2d   :  { %p1085_p8 = por %p1084_p7, %p1083_p6 }
  0x2f   :  { %p1086_p9 = pnand %p1085_p8, %p1079_p5 }
  0x31   :  { %1089 = shalt.err (!%p1086_p9)
}
  0x32   :  { %46 = dma.hbm_to_vmem [thread:$0]  %s1271_s2, 1024, %s41_s11, [#allocation7], %s1120_s24, %s1120_s24, %s1121_s25  }
  0x33   :  { %1112 = dma.done.wait [#allocation4], 256  }
  0x34   :  { %1113 = vsyncadd [#allocation4], 4294967040 }
  0x35   :  { %1114 = dma.done.wait [#allocation7], 1536  }
  0x36   :  { %1115 = vsyncadd [#allocation7], 4294965760  ;;  %vm66_vm0 = vcmask 261120   ;;  %v62_v0 = vld [vmem:[#allocation6] sm:$0xff]  ;;  %v63_v1 = vld [vmem:[#allocation6 + $0x8] sm:$0xff]  ;;  %v1123_v8 = vmov 0.0   ;;  %v786_v27 = vlaneseq }
  0x37   :  { %v64_v2 = vld [vmem:[#allocation6 + $0x10] sm:$0xff]  ;;  %v993_v3 = vpack.c.bf16 %v63_v1, %v62_v0  ;;  %v65_v4 = vld [vmem:[#allocation6 + $0x18] sm:$0xff]  ;;  %968 = vmatprep.subr.mxu1 %v1123_v8  ;;  %vm1124_vm1 = vmmov 0   ;;  %v151_v9 = vld [vmem:[#allocation8 + $0x20] sm:$0xff]  ;;  %vm163_vm2 = vcmask 64512   ;;  %s1125_s2 = smov 64  }
  0x38   :  { %v60_v5 = vld [vmem:[#allocation3] sm:$0xff]  ;;  %v997_v6 = vpack.c.bf16 %v65_v4, %v64_v2  ;;  %v61_v7 = vld [vmem:[#allocation3 + $0x8] sm:$0xff]  ;;  %970 = vmatprep.mubr.msk.f32.mxu1 %vm1124_vm1, %v1123_v8  ;;  %s1126_s21 = smov 96   ;;  %s1127_s22 = smov 32   ;;  %v155_v15 = vld [vmem:[#allocation8 + $0x8] sm:$0xff]  ;;  %v787_v29 = vshrl.u32 %v786_v27, 7 }
  0x39   :  { %950 = vmatprep.mubr.msk.f32.mxu0 %vm66_vm0, %v60_v5  ;;  %994 = vmatprep.subr.bf16.mxu0 %v993_v3  ;;  %v461_v13 = vld [vmem:[#allocation8 + $0x10] sm:$0xff]  ;;  %v156_v19 = vld [vmem:[#allocation8 + $0x28] sm:$0xff]  ;;  %v622_v21 = vld [vmem:[#allocation8 + $0x18] sm:$0xff]  ;;  %v1128_v25 = vmov 1983009808   ;;  %vm874_vm3 = vcmask 523264  }
  0x3a   :  { %996 = vmatpush3.bf16.msra.mxu0 %v993_v3  ;;  %v462_v17 = vld [vmem:[#allocation8 + $0x30] sm:$0xff]  ;;  %v150_v23 = vld [vmem:[#allocation8] sm:$0xff]  ;;  %v623_v24 = vld [vmem:[#allocation8 + $0x38] sm:$0xff]  ;;  %v784_v26 = vunpack.c.l.s4 %v1128_v25  ;;  %v1129_v31 = vmov 1934713408   ;;  %vm876_vm4 = vcmask 785408  }
  0x3b   :  { %998 = vmatprep.subr.bf16.mxu0 %v997_v6  ;;  %v815_v32 = vunpack.c.l.s4 %v1129_v31  ;;  %s1130_s23 = smov [#allocation9]  }
  0x3c   :  { %v785_v28 = vunpack.c.0.s8 %v784_v26  ;;  %s899_s24 = sshll.u32 %s1130_s23, 4  ;;  %s900_s24 = int_to_ptr.vmem [resolvable:$true] %s899_s24 }
  0x3d   :  { %v816_v38 = vunpack.c.0.s8 %v815_v32  ;;  %s1090_s25 = scalar_lea.vmem %s900_s24, 64  ;;  %p1095_p11 = scmp.lt.s32.totalorder %s900_s24, %s900_s24 }
  0x3e   :  { %1000 = vmatpush3.bf16.msra.mxu0 %v997_v6  ;;  %v788_v36 = vsub.s32 %v785_v28, %v787_v29  ;;  %p1091_p10 = scmp.ne.s32.totalorder %s900_s24, %s1090_s25  ;;  %p1096_p12 = scmp.lt.s32.totalorder %s1090_s25, %s1090_s25 }
  0x3f   :  { %953 = vmatprep.subr.mxu0 %v1123_v8  ;;  %v819_v48 = vsub.s32 %v816_v38, %v787_v29 }
  0x40   :  { %p1097_p13 = por %p1096_p12, %p1095_p11 }
  0x41   :  { %951 = vmatmul.mubr.msk.f32.vlgmr.msra.gmra.mrb[0].mxu0 %vm66_vm0, %v61_v7 }
  0x42   :  { %955 = vmatprep.mubr.msk.f32.mxu0 %vm1124_vm1, %v1123_v8  ;;  %p1098_p0 = pnand %p1097_p13, %p1091_p10 }
 0x114   :  { %v952_v10 = vpop.f32.mrb[0].mxu0 }
 0x115   :  { %543 = vrot.lane.b32.xlu1 %v952_v10, %s1125_s2  ;;  %v139_v11 = vpop.f32.mrb[1].mxu0  ;;  %969 = vmatpush3.msra.mxu1 %v952_v10 }
 0x116   :  { %466 = vrot.lane.b32.xlu0 %v139_v11, %s1125_s2  ;;  %971 = vmatmul.mubr.msk.f32.vlgmr.msra.gmra.mrb[0].mxu1 %vm163_vm2, %v151_v9 }
 0x117   :  { %973 = vmatprep.subr.mxu1 %v1123_v8  ;;  %975 = vmatprep.mubr.msk.f32.mxu1 %vm1124_vm1, %v1123_v8 }
 0x119   :  { %238 = vrot.lane.b32.xlu1 %v952_v10, %s1126_s21 }
 0x11a   :  { %160 = vrot.lane.b32.xlu0 %v139_v11, %s1126_s21 }
 0x11d   :  { %704 = vrot.lane.b32.xlu1 %v952_v10, %s1127_s22 }
 0x11e   :  { %627 = vrot.lane.b32.xlu0 %v139_v11, %s1127_s22 }
 0x187   :  { %v544_v12 = vpop.permute.xlu1 %543 }
 0x188   :  { %v467_v14 = vpop.permute.xlu0 %466 }
 0x189   :  { %974 = vmatpush3.msra.mxu1 %v467_v14 }
 0x18a   :  { %976 = vmatmul.mubr.msk.f32.vlgmr.msra.gmra.mrb[2].mxu1 %vm163_vm2, %v461_v13  ;;  %978 = vmatprep.subr.mxu1 %v1123_v8 }
 0x18b   :  { %979 = vmatpush3.msra.mxu1 %v544_v12  ;;  %980 = vmatprep.mubr.msk.f32.mxu1 %vm1124_vm1, %v1123_v8  ;;  %v239_v18 = vpop.permute.xlu1 %238 }
 0x18c   :  { %v161_v16 = vpop.permute.xlu0 %160  ;;  %983 = vmatprep.subr.mxu1 %v1123_v8 }
 0x18d   :  { %954 = vmatpush3.msra.mxu0 %v161_v16 }
 0x18e   :  { %956 = vmatmul.mubr.msk.f32.vlgmr.msra.gmra.mrb[2].mxu0 %vm163_vm2, %v155_v15  ;;  %958 = vmatprep.subr.mxu0 %v1123_v8 }
 0x18f   :  { %981 = vmatmul.mubr.msk.f32.vlgmr.msra.gmra.mrb[0].mxu1 %vm163_vm2, %v462_v17  ;;  %959 = vmatpush3.msra.mxu0 %v239_v18  ;;  %v705_v22 = vpop.permute.xlu1 %704 }
 0x190   :  { %v628_v20 = vpop.permute.xlu0 %627  ;;  %960 = vmatprep.mubr.msk.f32.mxu0 %vm1124_vm1, %v1123_v8  ;;  %963 = vmatprep.subr.mxu0 %v1123_v8 }
 0x191   :  { %984 = vmatpush3.msra.mxu1 %v628_v20  ;;  %985 = vmatprep.mubr.msk.f32.mxu1 %vm1124_vm1, %v1123_v8 }
 0x192   :  { %961 = vmatmul.mubr.msk.f32.vlgmr.msra.gmra.mrb[4].mxu0 %vm163_vm2, %v156_v19  ;;  %988 = vmatprep.subr.mxu1 %v1123_v8 }
 0x193   :  { %964 = vmatpush3.msra.mxu0 %v139_v11  ;;  %986 = vmatmul.mubr.msk.f32.vlgmr.msra.gmra.mrb[2].mxu1 %vm163_vm2, %v622_v21 }
 0x194   :  { %989 = vmatpush3.msra.mxu1 %v705_v22  ;;  %965 = vmatprep.mubr.msk.f32.mxu0 %vm1124_vm1, %v1123_v8 }
 0x195   :  { %990 = vmatprep.mubr.msk.f32.mxu1 %vm1124_vm1, %v1123_v8 }
 0x196   :  { %966 = vmatmul.mubr.msk.f32.vlgmr.msra.gmra.mrb[2].mxu0 %vm163_vm2, %v150_v23 }
 0x197   :  { %991 = vmatmul.mubr.msk.f32.vlgmr.msra.gmra.mrb[0].mxu1 %vm163_vm2, %v623_v24 }
 0x265   :  { %v310_v30 = vpop.f32.mrb[4].mxu0 }
 0x266   :  { %v699_v33 = vpop.f32.mrb[2].mxu1  ;;  %v962_v34 = vpop.f32.mrb[5].mxu0 }
 0x267   :  { %v987_v35 = vpop.f32.mrb[3].mxu1 }
 0x269   :  { %v383_v37 = vpop.f32.mrb[2].mxu0 }
 0x26a   :  { %v1001_v39 = vadd.f32 %v699_v33, %v383_v37  ;;  %v776_v40 = vpop.f32.mrb[0].mxu1  ;;  %v967_v41 = vpop.f32.mrb[3].mxu0 }
 0x26b   :  { %v1002_v42 = vadd.f32 %v776_v40, %v310_v30  ;;  %v992_v43 = vpop.f32.mrb[1].mxu1 }
 0x26c   :  { %v782_v44 = vcombine.high %v1001_v39, %v1123_v8  ;;  %v789_v45 = vrot.slane %v1001_v39, %v788_v36 }
 0x26d   :  { %v797_v46 = vcombine.high %v1002_v42, %v1123_v8  ;;  %v804_v47 = vrot.slane %v1002_v42, %v788_v36 }
 0x26e   :  { %v796_v49 = vrot.slane %v782_v44, %v788_v36 }
 0x26f   :  { %v811_v50 = vrot.slane %v797_v46, %v788_v36  ;;  %v812_v51 = vcombine.low %v789_v45, %v804_v47  ;;  %v813_v52 = vcombine.high %v789_v45, %v804_v47 }
 0x271   :  { %v828_v53 = vcombine.low %v796_v49, %v811_v50  ;;  %v827_v54 = vrot.slane %v813_v52, %v819_v48  ;;  %v829_v55 = vcombine.high %v796_v49, %v811_v50  ;;  %v820_v56 = vrot.slane %v812_v51, %v819_v48 }
 0x273   :  { %853 = vrot.lane.b32.xlu0 %v827_v54, %s1125_s2  ;;  %v843_v57 = vrot.slane %v829_v55, %v819_v48  ;;  %v836_v58 = vrot.slane %v828_v53, %v819_v48  ;;  %v844_v59 = vcombine.high %v820_v56, %v1123_v8  ;;  %v845_v61 = vcombine.high %v827_v54, %v1123_v8 }
 0x275   :  { %865 = vrot.lane.b32.xlu1 %v843_v57, %s1125_s2  ;;  %v846_v60 = vcombine.high %v836_v58, %v1123_v8  ;;  %v847_v62 = vcombine.high %v843_v57, %v1123_v8 }
 0x277   :  { %849 = vrot.lane.b32.xlu0 %v844_v59, %s1127_s22 }
 0x279   :  { %861 = vrot.lane.b32.xlu1 %v846_v60, %s1127_s22 }
 0x27b   :  { %857 = vrot.lane.b32.xlu0 %v845_v61, %s1126_s21 }
 0x27d   :  { %869 = vrot.lane.b32.xlu1 %v847_v62, %s1126_s21 }
 0x2e5   :  { %v854_v63 = vpop.permute.xlu0 %853 }
 0x2e7   :  { %v866_v0 = vpop.permute.xlu1 %865 }
 0x2e9   :  { %v850_v1 = vpop.permute.xlu0 %849 }
 0x2ea   :  { %v873_v3 = vsel %vm66_vm0, %v820_v56, %v850_v1 }
 0x2eb   :  { %v862_v2 = vpop.permute.xlu1 %861  ;;  %v875_v6 = vsel %vm874_vm3, %v873_v3, %v854_v63 }
 0x2ec   :  { %v878_v4 = vsel %vm66_vm0, %v836_v58, %v862_v2 }
 0x2ed   :  { %v858_v5 = vpop.permute.xlu0 %857  ;;  %v879_v7 = vsel %vm874_vm3, %v878_v4, %v866_v0 }
 0x2ee   :  { %v877_v10 = vsel %vm876_vm4, %v875_v6, %v858_v5 }
 0x2ef   :  { %v870_v9 = vpop.permute.xlu1 %869 }
 0x2f0   :  { %v880_v8 = vsel %vm876_vm4, %v879_v7, %v870_v9 }
 0x2f1   :  { %v883_v11 = vcombine.low %v877_v10, %v880_v8 }
 0x2f3   :  { %919 = vst.sshfl [vmem:[#allocation9] sm:$0x33 pattern:$0x76325410] %v883_v11 }
 0x2f4   :  { %1101 = shalt.err (!%p1098_p0)
}
 0x2f5   :  { %s1102_s28 = scalar_lea.hbm %s1272_s3, 64 }
 0x2f6   :  { %p1103_p1 = scmp.ne.s32.totalorder %s1272_s3, %s1102_s28  ;;  %p1106_p2 = scmp.lt.u32.totalorder %s1102_s28, %s1272_s3 }
 0x2f8   :  { %p1108_p3 = pnand %p1106_p2, %p1103_p1 }
 0x2fa   :  { %1111 = shalt.err (!%p1108_p3)
}
 0x2fb   :  { %902 = dma.vmem_to_hbm [thread:$0]  %s900_s24, 64, %s1272_s3, [#allocation5]  }
 0x2fc   :  { %1116 = dma.done.wait [#allocation5], 64  }
 0x2fd   :  { %1117 = vsyncadd [#allocation5], 4294967232 }
 0x2fe   :  { %906 = vsyncpa [#allocation4], 1 }
 0x2ff   :  { %907 = vsyncpa [#allocation7], 1 }
 0x300   :  { %908 = vsyncpa [#allocation5], 1 }

</bundles_post_ra>
